<compile_context>
chip_gen: v6e
topology: v6e:2x2x1
jax: 0.10.0
libtpu: 0.0.40
codegen_flags: <defaults>
</compile_context>

<pallas_src>
import jax
import jax.numpy as jnp
from jax import lax
from jax.experimental import pallas as pl
from jax.experimental.pallas import tpu as pltpu


def _round_up(x, m):
    return ((x + m - 1) // m) * m


def mlp_kernel(x_ref, w1t_ref, b1_ref, w2_ref, b2_ref, o_ref, acc_ref):
    k = pl.program_id(1)

    @pl.when(k == 0)
    def _():
        acc_ref[...] = jnp.zeros_like(acc_ref)

    # fc1 partial product: (tb, tk) . (Hp, tk)^T -> (tb, Hp), f32 accumulation
    acc_ref[...] += lax.dot_general(
        x_ref[...], w1t_ref[...],
        dimension_numbers=(((1,), (1,)), ((), ())),
        preferred_element_type=jnp.float32)

    @pl.when(k == pl.num_programs(1) - 1)
    def _():
        h = acc_ref[...] + b1_ref[...]          # f32 bias add (VPU)
        h = jnp.maximum(h, 0.0)                 # ReLU in f32
        out = jnp.dot(h.astype(w2_ref.dtype), w2_ref[...],
                      preferred_element_type=jnp.float32)
        out = out + b2_ref[...]                 # f32 bias add
        o_ref[...] = out.astype(o_ref.dtype)    # lane-dense (tb, 128) store


def mlp_forward(x, w1, b1, w2, b2, *, tb=128, tk=2048,
                compute_dtype=jnp.bfloat16,
                vmem_limit_bytes=48 * 1024 * 1024):
    """x: (B, D). w1: (D, H), b1: (1, H), w2: (H, C), b2: (1, C) -> (B, C)."""
    B, D = x.shape
    Din, H = w1.shape
    C = w2.shape[1]
    assert Din == D and w2.shape[0] == H

    # Lane-dense padded dims (hidden / classes padded with zeros -> exact math).
    Hp = _round_up(H, 128)
    Cp = _round_up(C, 128)
    Bp = _round_up(B, tb)
    Dp = _round_up(D, tk)

    # Pad + cast compute operands to bf16; biases stay f32.
    x_p = jnp.pad(x, ((0, Bp - B), (0, Dp - D))).astype(compute_dtype)
    w1t = jnp.pad(w1.T, ((0, Hp - H), (0, Dp - D))).astype(compute_dtype)
    b1p = jnp.pad(b1.reshape(1, -1), ((0, 0), (0, Hp - H))).astype(jnp.float32)
    w2p = jnp.pad(w2, ((0, Hp - H), (0, Cp - C))).astype(compute_dtype)
    b2p = jnp.pad(b2.reshape(1, -1), ((0, 0), (0, Cp - C))).astype(jnp.float32)

    grid = (Bp // tb, Dp // tk)          # reduction axis (K over D) last

    itemsize = jnp.dtype(compute_dtype).itemsize
    cost = pl.CostEstimate(
        flops=2 * B * D * H + 2 * B * H * C,
        transcendentals=0,
        bytes_accessed=(x_p.size + w1t.size + w2p.size) * itemsize
                       + (b1p.size + b2p.size + Bp * Cp) * 4)

    out_padded = pl.pallas_call(
        mlp_kernel,
        out_shape=jax.ShapeDtypeStruct((Bp, Cp), jnp.float32),
        grid_spec=pltpu.PrefetchScalarGridSpec(
            num_scalar_prefetch=0,
            grid=grid,
            in_specs=[
                pl.BlockSpec((tb, tk), lambda i, k: (i, k)),   # x tile
                pl.BlockSpec((Hp, tk), lambda i, k: (0, k)),   # W1^T tile (D on lanes)
                pl.BlockSpec((1, Hp), lambda i, k: (0, 0)),    # b1 (full)
                pl.BlockSpec((Hp, Cp), lambda i, k: (0, 0)),   # W2 (full, tiny)
                pl.BlockSpec((1, Cp), lambda i, k: (0, 0)),    # b2 (full)
            ],
            out_specs=pl.BlockSpec((tb, Cp), lambda i, k: (i, 0)),
            scratch_shapes=[pltpu.VMEM((tb, Hp), jnp.float32)],
        ),
        compiler_params=pltpu.CompilerParams(
            dimension_semantics=("parallel", "arbitrary"),
            vmem_limit_bytes=vmem_limit_bytes),
        cost_estimate=cost,
    )(x_p, w1t, b1p, w2p, b2p)

    return out_padded[:B, :C].astype(x.dtype)


def init_linear(key, fan_in, fan_out, dtype=jnp.float32):
    """Deterministic PyTorch-style init: U(-1/sqrt(fan_in), 1/sqrt(fan_in))."""
    kw, kb = jax.random.split(key)
    bound = 1.0 / (fan_in ** 0.5)
    w = jax.random.uniform(kw, (fan_in, fan_out), dtype, -bound, bound)
    b = jax.random.uniform(kb, (1, fan_out), dtype, -bound, bound)
    return w, b


if __name__ == "__main__":
    # Small demo shapes consistent with the module structure
    # (real input_size=607500 shrunk to 2048; the K-tiled path is still exercised).
    batch, input_size, hidden, num_classes = 16, 2048, 50, 5

    key = jax.random.PRNGKey(0)
    kx, k1, k2 = jax.random.split(key, 3)

    x = jax.random.normal(kx, (batch, input_size), jnp.float32)
    w1, b1 = init_linear(k1, input_size, hidden)
    w2, b2 = init_linear(k2, hidden, num_classes)

    # Small tiles for the demo (grid = (1, 4)); real workload would use
    # tb=128..256, tk=2048..8192 depending on chip generation.
    out = mlp_forward(x, w1, b1, w2, b2, tb=16, tk=512)
    out = jax.block_until_ready(out)

    # Reference with the same bf16 input rounding / f32 accumulation as the kernel.
    f32 = jnp.float32
    xb = x.astype(jnp.bfloat16).astype(f32)
    w1b = w1.astype(jnp.bfloat16).astype(f32)
    w2b = w2.astype(jnp.bfloat16).astype(f32)
    h_ref = jnp.maximum(xb @ w1b + b1, 0.0).astype(jnp.bfloat16).astype(f32)
    ref = h_ref @ w2b + b2

    assert out.shape == (batch, num_classes)
    assert jnp.allclose(out, ref, atol=2e-2, rtol=2e-2), \
        float(jnp.max(jnp.abs(out - ref)))

    print("KERNEL_OK")
</pallas_src>

<mosaic_0001>
module attributes {stable_mosaic.version = 11 : i64} {
  func.func @mlp_kernel(%arg0: i32, %arg1: i32, %arg2: memref<16x512xbf16, #tpu.memory_space<vmem>>, %arg3: memref<128x512xbf16, #tpu.memory_space<vmem>>, %arg4: memref<1x128xf32, #tpu.memory_space<vmem>>, %arg5: memref<128x128xbf16, #tpu.memory_space<vmem>>, %arg6: memref<1x128xf32, #tpu.memory_space<vmem>>, %arg7: memref<16x128xf32, #tpu.memory_space<vmem>>, %arg8: memref<16x128xf32, #tpu.memory_space<vmem>>) attributes {dimension_semantics = [#tpu.dimension_semantics<parallel>, #tpu.dimension_semantics<arbitrary>], iteration_bounds = array<i64: 1, 4>, scalar_prefetch = 0 : i64, scratch_operands = 1 : i64, tpu.core_type = #tpu.core_type<tc>, window_params = [{transform_indices = @transform_0, window_bounds = array<i64: 16, 512>}, {transform_indices = @transform_1, window_bounds = array<i64: 128, 512>}, {pipeline_mode = #tpu.pipeline_mode<synchronous>, transform_indices = @transform_2, window_bounds = array<i64: 1, 128>}, {pipeline_mode = #tpu.pipeline_mode<synchronous>, transform_indices = @transform_3, window_bounds = array<i64: 128, 128>}, {pipeline_mode = #tpu.pipeline_mode<synchronous>, transform_indices = @transform_4, window_bounds = array<i64: 1, 128>}, {transform_indices = @transform_5, window_bounds = array<i64: 16, 128>}]} {
    %c0_i32 = arith.constant 0 : i32
    %0 = arith.cmpi eq, %arg1, %c0_i32 : i32
    %1 = arith.extui %0 : i1 to i32
    %c0_i32_0 = arith.constant 0 : i32
    %2 = arith.cmpi ne, %1, %c0_i32_0 : i32
    scf.if %2 {
      %cst_9 = arith.constant 0.000000e+00 : f32
      %12 = vector.broadcast %cst_9 : f32 to vector<16x128xf32>
      %c0_10 = arith.constant 0 : index
      %c0_11 = arith.constant 0 : index
      %13 = vector.load %arg8[%c0_10, %c0_11] : memref<16x128xf32, #tpu.memory_space<vmem>>, vector<16x128xf32>
      tpu.vector_store %arg8[%c0_10, %c0_11], %12 {strides = array<i32>} : memref<16x128xf32, #tpu.memory_space<vmem>>, vector<16x128xf32>,
    } else {
    }
    %c0 = arith.constant 0 : index
    %c0_1 = arith.constant 0 : index
    %3 = vector.load %arg8[%c0, %c0_1] : memref<16x128xf32, #tpu.memory_space<vmem>>, vector<16x128xf32>
    %c0_2 = arith.constant 0 : index
    %c0_3 = arith.constant 0 : index
    %4 = vector.load %arg2[%c0_2, %c0_3] : memref<16x512xbf16, #tpu.memory_space<vmem>>, vector<16x512xbf16>
    %c0_4 = arith.constant 0 : index
    %c0_5 = arith.constant 0 : index
    %5 = vector.load %arg3[%c0_4, %c0_5] : memref<128x512xbf16, #tpu.memory_space<vmem>>, vector<128x512xbf16>
    %cst = arith.constant dense<0.000000e+00> : vector<16x128xf32>
    %6 = tpu.matmul %4, %5, %cst {dimension_numbers = #tpu.dot_dimension_numbers<[1], [1], [0], [0], [0, 0, 1, 0], [], []>} : vector<16x512xbf16>, vector<128x512xbf16>, vector<16x128xf32> -> vector<16x128xf32>
    %7 = arith.addf %3, %6 : vector<16x128xf32>
    %c0_6 = arith.constant 0 : index
    %c0_7 = arith.constant 0 : index
    %8 = vector.load %arg8[%c0_6, %c0_7] : memref<16x128xf32, #tpu.memory_space<vmem>>, vector<16x128xf32>
    tpu.vector_store %arg8[%c0_6, %c0_7], %7 {strides = array<i32>} : memref<16x128xf32, #tpu.memory_space<vmem>>, vector<16x128xf32>,
    %c3_i32 = arith.constant 3 : i32
    %9 = arith.cmpi eq, %arg1, %c3_i32 : i32
    %10 = arith.extui %9 : i1 to i32
    %c0_i32_8 = arith.constant 0 : i32
    %11 = arith.cmpi ne, %10, %c0_i32_8 : i32
    scf.if %11 {
      %c0_9 = arith.constant 0 : index
      %c0_10 = arith.constant 0 : index
      %12 = vector.load %arg8[%c0_9, %c0_10] : memref<16x128xf32, #tpu.memory_space<vmem>>, vector<16x128xf32>
      %c0_11 = arith.constant 0 : index
      %c0_12 = arith.constant 0 : index
      %13 = vector.load %arg4[%c0_11, %c0_12] : memref<1x128xf32, #tpu.memory_space<vmem>>, vector<1x128xf32>
      %14 = vector.broadcast %13 : vector<1x128xf32> to vector<16x128xf32>
      %15 = arith.addf %12, %14 : vector<16x128xf32>
      %cst_13 = arith.constant 0.000000e+00 : f32
      %16 = vector.broadcast %cst_13 : f32 to vector<16x128xf32>
      %17 = arith.maximumf %15, %16 : vector<16x128xf32>
      %18 = arith.truncf %17 : vector<16x128xf32> to vector<16x128xbf16>
      %c0_14 = arith.constant 0 : index
      %c0_15 = arith.constant 0 : index
      %19 = vector.load %arg5[%c0_14, %c0_15] : memref<128x128xbf16, #tpu.memory_space<vmem>>, vector<128x128xbf16>
      %cst_16 = arith.constant dense<0.000000e+00> : vector<16x128xf32>
      %20 = tpu.matmul %18, %19, %cst_16 {dimension_numbers = #tpu.dot_dimension_numbers<[1], [0], [0], [1], [0, 0, 1, 1], [], []>} : vector<16x128xbf16>, vector<128x128xbf16>, vector<16x128xf32> -> vector<16x128xf32>
      %c0_17 = arith.constant 0 : index
      %c0_18 = arith.constant 0 : index
      %21 = vector.load %arg6[%c0_17, %c0_18] : memref<1x128xf32, #tpu.memory_space<vmem>>, vector<1x128xf32>
      %22 = vector.broadcast %21 : vector<1x128xf32> to vector<16x128xf32>
      %23 = arith.addf %20, %22 : vector<16x128xf32>
      %c0_19 = arith.constant 0 : index
      %c0_20 = arith.constant 0 : index
      %24 = vector.load %arg7[%c0_19, %c0_20] : memref<16x128xf32, #tpu.memory_space<vmem>>, vector<16x128xf32>
      tpu.vector_store %arg7[%c0_19, %c0_20], %23 {strides = array<i32>} : memref<16x128xf32, #tpu.memory_space<vmem>>, vector<16x128xf32>,
    } else {
    }
    return
  }
  func.func @transform_0(%arg0: i32, %arg1: i32) -> (i32, i32) {
    %c0_i32 = arith.constant 0 : i32
    return %arg0, %arg1 : i32, i32
  }
  func.func @transform_1(%arg0: i32, %arg1: i32) -> (i32, i32) {
    %c0_i32 = arith.constant 0 : i32
    %c0_i32_0 = arith.constant 0 : i32
    return %c0_i32, %arg1 : i32, i32
  }
  func.func @transform_2(%arg0: i32, %arg1: i32) -> (i32, i32) {
    %c0_i32 = arith.constant 0 : i32
    %c0_i32_0 = arith.constant 0 : i32
    %c0_i32_1 = arith.constant 0 : i32
    return %c0_i32, %c0_i32_0 : i32, i32
  }
  func.func @transform_3(%arg0: i32, %arg1: i32) -> (i32, i32) {
    %c0_i32 = arith.constant 0 : i32
    %c0_i32_0 = arith.constant 0 : i32
    %c0_i32_1 = arith.constant 0 : i32
    return %c0_i32, %c0_i32_0 : i32, i32
  }
  func.func @transform_4(%arg0: i32, %arg1: i32) -> (i32, i32) {
    %c0_i32 = arith.constant 0 : i32
    %c0_i32_0 = arith.constant 0 : i32
    %c0_i32_1 = arith.constant 0 : i32
    return %c0_i32, %c0_i32_0 : i32, i32
  }
  func.func @transform_5(%arg0: i32, %arg1: i32) -> (i32, i32) {
    %c0_i32 = arith.constant 0 : i32
    %c0_i32_0 = arith.constant 0 : i32
    return %arg0, %c0_i32 : i32, i32
  }
}

</mosaic_0001>

<bundles_post_ra>
// kernel: tpu_custom_call.1
= control target key start
LH: loop header
LB: loop body
LE: loop exit
PB: predicated region body
PF: predicated region fallthrough
CT: control target
= control target key end

     0   :  { %s1525_s0 = inlined_call_operand.hbm [shape: bf16[16,2048], index: 0, kind: input, shape index: {}]   ;;  %s1526_s1 = inlined_call_operand.hbm [shape: bf16[128,2048], index: 1, kind: input, shape index: {}]   ;;  %s1527_s2 = inlined_call_operand.vmem [shape: f32[1,128], index: 2, kind: input, shape index: {}]   ;;  %s1528_s3 = inlined_call_operand.hbm [shape: bf16[128,128], index: 3, kind: input, shape index: {}]   ;;  %s1529_s4 = inlined_call_operand.vmem [shape: f32[1,128], index: 4, kind: input, shape index: {}]   ;;  %s1530_s5 = inlined_call_operand.hbm [shape: f32[16,128], index: 5, kind: output, shape index: {}]  }
   0x1   :  { %1533 = sst [smem:[#allocation14_spill]] %s1525_s0 }
   0x2   :  { %1534 = sst [smem:[#allocation15_spill]] %s1526_s1 }
   0x3   :  { %1535 = sst [smem:[#allocation16_spill]] %s1528_s3 }
   0x4   :  { %10 = vsyncpa [#allocation4], 0 }
   0x5   :  { %12 = vsyncpa [#allocation4 + $0x1], 0 }
   0x6   :  { %13 = vsyncpa [#allocation7], 0 }
   0x7   :  { %15 = vsyncpa [#allocation7 + $0x1], 0 }
   0x8   :  { %16 = vsyncpa [#allocation5], 0  ;;  %s1323_s18 = smov 0   ;;  %s1325_s19 = smov 0  }
   0x9   :  { %s1327_s20 = smov 0   ;;  %s1329_s21 = smov 0  }
   0xa   :  { %s1331_s22 = smov 0   ;;  %s1333_s23 = smov 0  }
   0xb LB: > { %s1352_s24 = sadd.s32 4294967295, %s1277_s23   ;;  %s43_s25 = sadd.s32 1, %s1265_s20  ;;  %s1277_s23 = sphi %s1333_s23, %s22_s23   ;;  %s1273_s22 = sphi %s1331_s22, %s1549_s22   ;;  %s1269_s21 = sphi %s1329_s21, %s1548_s21   ;;  %s1265_s20 = sphi %s1327_s20, %s1547_s20   ;;  %s1261_s19 = sphi %s1325_s19, %s1546_s19   ;;  %s1257_s18 = sphi %s1323_s18, %s1545_s18  }
   0xc   : > { %p50_p0 = scmp.ne.s32.totalorder %s1265_s20, %s1261_s19  ;;  %p51_p1 = scmp.eq.s32.totalorder %s1277_s23, 0 }
   0xd   : > { %p56_p2 = scmp.ne.s32.totalorder %s1261_s19, %s1257_s18  ;;  %p57_p3 = scmp.eq.s32.totalorder %s1352_s24, 0 }
   0xe   : > { %p52_p4 = por %p51_p1, %p50_p0  ;;  %p863_p5 = scmp.ge.s32.totalorder %s1277_s23, 1 }
   0xf   : > { %p1363_p6 = por %p57_p3, %p56_p2  ;;  %p182_p7 = scmp.lt.s32.totalorder %s1277_s23, 5 }
  0x10   : > { %s1279_s28 = smov [#allocation8]   ;;  %p983_p10 = scmp.lt.s32.totalorder %s1277_s23, 4 }
  0x11   : > { %s1536_s26 = scalar_select %p1363_p6, 1, 0 }
  0x12   : > { %p1368_p8 = pnand %p863_p5, %p182_p7  ;;  %s197_s29 = sshll.u32 %s1279_s28, 4  ;;  %s198_s29 = int_to_ptr.vmem [resolvable:$true] %s197_s29 }
  0x13   : > { %p1381_p12 = pnand %p983_p10, %p52_p4  ;;  %s31_s7 = sadd.s32 1, %s1273_s22 }
  0x14   : > { %s1537_s27 = scalar_select %p1368_p8, 1, 0 }
  0x15   : > { %p971_p9 = pneg %p1368_p8  ;;  %s1120_s8 = scalar_lea.vmem %s198_s29, 1024 }
  0x16   : > { %p1121_p0 = scmp.ne.s32.totalorder %s198_s29, %s1120_s8  ;;  %p1128_p5 = scmp.lt.s32.totalorder %s198_s29, %s198_s29 }
  0x17   : > { %p1377_p11 = pnand %p971_p9, %p57_p3  ;;  %p1129_p7 = scmp.lt.s32.totalorder %s1120_s8, %s1120_s8 }
  0x19   : > { %p1111_p13 = pneg %p1377_p11  ;;  %p1130_p6 = por %p1129_p7, %p1128_p5 }
  0x1b   : > { %p1123_p1 = pnand %p1121_p0, %p1111_p13 }
  0x1d   : > { %p1124_p2 = pneg %p1123_p1 }
  0x1f   : > { %p1131_p8 = pnand %p1130_p6, %p1124_p2 }
  0x21   : > { %1134 = shalt.err (!%p1131_p8)
}
  0x22   : > { %s1280_s9 = smov 64   ;;  %s1281_s10 = smov 4  }
  0x23   : > { %s1540_s3 = sld [smem:[#allocation16_spill]]  ;;  %p32_p4 = scmp.ge.s32.totalorder %s31_s7, 4 }
  0x24   : > { %s1394_s13 = sand.u32 1, %s1265_s20   ;;  %s928_s14 = sshll.u32 %s1273_s22, 8 }
  0x25   : > { %s1551_s7 = smov (%p32_p4, %s31_s7), 0  ;;  %s866_s15 = sshll.u32 %s1394_s13, 5 }
  0x26   : > { %s39_s16 = ssub.s32 %s1273_s22, %s1551_s7  ;;  %s1541_s0 = sld [smem:[#allocation14_spill]] }
  0x27   : > { %p41_p6 = scmp.eq.s32.totalorder %s39_s16, 0  ;;  %s218_s30 = scalar_lea.vmem [#allocation3], %s866_s15 }
  0x28   : > { %s228_s8 = sshll.u32 %s218_s30, 4  ;;  %s1542_s1 = sld [smem:[#allocation15_spill]]  ;;  %s229_s8 = int_to_ptr.vmem [resolvable:$true] %s228_s8 }
  0x29   : > { %974 = dma.hbm_to_vmem [thread:$0]  (!%p1377_p11), %s1540_s3, 1024, %s198_s29, [#allocation7], %s1280_s9, %s1280_s9, %s1281_s10  }
  0x2a   : > { %s1408_s29 = scalar_select %p41_p6, %s1265_s20, %s43_s25  }
  0x2b   : > { %s215_s12 = scalar_lea.sflag [#allocation4], %s1394_s13  ;;  %p1137_p8 = pneg %p1381_p12 }
  0x2c   : > { %s227_s28 = scalar_lea.hbm %s1541_s0, %s928_s14  ;;  %s1148_s3 = scalar_lea.vmem %s229_s8, 512 }
  0x2d   : > { %p1149_p9 = scmp.ne.s32.totalorder %s229_s8, %s1148_s3  ;;  %s1282_s15 = smov [#allocation3]  }
  0x2e   : > { %s1413_s11 = scalar_lea.hbm %s1542_s1, %s928_s14  ;;  %s1153_s16 = sshll.u32 %s1282_s15, 4  ;;  %s1154_s16 = int_to_ptr.vmem [resolvable:$false] %s1153_s16 }
  0x2f   : > { %p1151_p10 = pnand %p1149_p9, %p1137_p8  ;;  %s1155_s25 = scalar_lea.vmem %s1154_s16, 1024 }
  0x30   : > { %p1156_p13 = scmp.lt.s32.totalorder %s229_s8, %s1154_s16  ;;  %p1157_p0 = scmp.lt.s32.totalorder %s1155_s25, %s1148_s3 }
  0x31   : > { %p1152_p11 = pneg %p1151_p10 }
  0x32   : > { %p1158_p1 = por %p1157_p0, %p1156_p13 }
  0x34   : > { %p1159_p2 = pnand %p1158_p1, %p1152_p11 }
  0x36   : > { %1162 = shalt.err (!%p1159_p2)
}
  0x37   : > { %s1283_s14 = smov 1024   ;;  %s1284_s17 = smov 256  }
  0x38   : > { %s1285_s18 = smov 16   ;;  %s238_s30 = sand.u32 1, %s1277_s23  }
  0x39   : > { %978 = dma.hbm_to_vmem [thread:$0]  (!%p1381_p12), %s227_s28, 512, %s229_s8, %s215_s12, %s1283_s14, %s1284_s17, %s1285_s18  }
  0x3a   : > { %s869_s9 = sshll.u32 %s1394_s13, 8  ;;  %s239_s0 = scalar_lea.sflag [#allocation7], %s238_s30 }
  0x3b   : > { %s242_s10 = scalar_lea.vmem [#allocation6], %s869_s9  ;;  %s1286_s3 = smov [#allocation6]  }
  0x3c   : > { %s249_s15 = sshll.u32 %s242_s10, 4  ;;  %s1181_s25 = sshll.u32 %s1286_s3, 4  ;;  %s250_s15 = int_to_ptr.vmem [resolvable:$true] %s249_s15  ;;  %s1182_s25 = int_to_ptr.vmem [resolvable:$false] %s1181_s25 }
  0x3d   : > { %s1176_s16 = scalar_lea.vmem %s250_s15, 4096  ;;  %s1183_s1 = scalar_lea.vmem %s1182_s25, 8192 }
  0x3e   : > { %p1177_p5 = scmp.ne.s32.totalorder %s250_s15, %s1176_s16  ;;  %p1184_p6 = scmp.lt.s32.totalorder %s250_s15, %s1182_s25 }
  0x3f   : > { %p1185_p9 = scmp.lt.s32.totalorder %s1183_s1, %s1176_s16 }
  0x40   : > { %p1179_p7 = pnand %p1177_p5, %p1137_p8 }
  0x41   : > { %p1186_p10 = por %p1185_p9, %p1184_p6 }
  0x42   : > { %p1180_p4 = pneg %p1179_p7 }
  0x44   : > { %p1187_p11 = pnand %p1186_p10, %p1180_p4 }
  0x46   : > { %1190 = shalt.err (!%p1187_p11)
}
  0x47   : > { %981 = dma.hbm_to_vmem [thread:$0]  (!%p1381_p12), %s1413_s11, 4096, %s250_s15, %s239_s0, %s1283_s14, %s1284_s17, %s1285_s18  }
  0x48   : > { %p1543_p13 = scmp.ne.s32.totalorder %s1537_s27, 0 }
  0x49   : > { %s263_s13 = sand.u32 (!%p1543_p13), 1, %s1261_s19   ;;  %p1544_p8 = scmp.ne.s32.totalorder (!%p1543_p13), %s1536_s26, 0 }
  0x4a   : > { %261 = sbr.rel (%p1543_p13) target bundleno = 610 (0x262), region = 40  ;;  %s873_s28 = sshll.u32 (!%p1543_p13), %s263_s13, 5 }
  0x4b   : > { %s264_s8 = scalar_lea.sflag (!%p1543_p13), [#allocation4], %s263_s13  ;;  %s1434_s12 = scalar_lea.vmem (!%p1543_p13), [#allocation3], %s873_s28 }
  0x4f   : > { %1240 = dma.done.wait (%p1544_p8), %s264_s8, 512  }
  0x50   : > { %1242 = vsyncadd (%p1544_p8), %s264_s8, 4294966784  ;;  %s272_s1 = sand.u32 1, %s1352_s24   ;;  %s874_s6 = sshll.u32 %s263_s13, 8 }
  0x51   : > { %s273_s0 = scalar_lea.sflag [#allocation7], %s272_s1  ;;  %s1441_s11 = scalar_lea.vmem [#allocation6], %s874_s6 }
  0x52   : > { %1244 = dma.done.wait (%p1544_p8), %s273_s0, 4096  }
  0x53   : > { %1246 = vsyncadd (%p1544_p8), %s273_s0, 4294963200 }
  0x54   : > { %1248 = dma.done.wait (%p57_p3), [#allocation7], 1024  }
  0x55   : > { %1250 = vsyncadd (%p57_p3), [#allocation7], 4294966272  ;;  %p876_p12 = scmp.ne.s32.totalorder %s1269_s21, 0 }
  0x57   : > { %315 = sbr.rel (%p876_p12) target bundleno = 94 (0x5e), region = 56 }
  0x5c   : > { %v1287_v0 = vmov 0.0  }
  0x5d   : > { %316 = vst [vmem:[#allocation2] sm:$0xff] %v1287_v0  ;;  %317 = vst [vmem:[#allocation2 + $0x8] sm:$0xff] %v1287_v0 }
  0x5e PF: > { %v1047_v1 = vld [vmem:[%s1441_s11 + $0xe4] ss:$16 sps:$4 sm:$0xff]   ;;  %v1049_v2 = vld [vmem:[%s1441_s11 + $0xec] ss:$16 sps:$4 sm:$0xff]   ;;  %v1051_v3 = vld [vmem:[%s1441_s11 + $0xe0] ss:$16 sps:$4 sm:$0xff]  }
  0x5f   : > { %536 = vmatprep.subr.bf16.mxu0 %v1047_v1  ;;  %v1052_v4 = vld [vmem:[%s1441_s11 + $0xe8] ss:$16 sps:$4 sm:$0xff]   ;;  %577 = vmatprep.subr.bf16.mxu1 %v1049_v2  ;;  %v1053_v5 = vld [vmem:[%s1441_s11 + $0xc4] ss:$16 sps:$4 sm:$0xff]   ;;  %v1055_v6 = vld [vmem:[%s1441_s11 + $0xcc] ss:$16 sps:$4 sm:$0xff]  }
  0x60   : > { %537 = vmatpush1.bf16.xpose.msra.mxu0 %v1051_v3  ;;  %578 = vmatpush1.bf16.xpose.msra.mxu1 %v1052_v4  ;;  %v1057_v7 = vld [vmem:[%s1441_s11 + $0xc0] ss:$16 sps:$4 sm:$0xff]   ;;  %v1058_v8 = vld [vmem:[%s1441_s11 + $0xc8] ss:$16 sps:$4 sm:$0xff]   ;;  %v1059_v9 = vld [vmem:[%s1441_s11 + $0xa4] ss:$16 sps:$4 sm:$0xff]  }
  0x61   : > { %538 = vmatprep.subr.bf16.mxu0 %v1053_v5  ;;  %579 = vmatprep.subr.bf16.mxu1 %v1055_v6  ;;  %v1061_v10 = vld [vmem:[%s1441_s11 + $0xac] ss:$16 sps:$4 sm:$0xff]   ;;  %v1063_v11 = vld [vmem:[%s1441_s11 + $0xa0] ss:$16 sps:$4 sm:$0xff]   ;;  %v1064_v12 = vld [vmem:[%s1441_s11 + $0xa8] ss:$16 sps:$4 sm:$0xff]  }
  0x62   : > { %v1065_v13 = vld [vmem:[%s1441_s11 + $0x84] ss:$16 sps:$4 sm:$0xff]   ;;  %v1067_v14 = vld [vmem:[%s1441_s11 + $0x8c] ss:$16 sps:$4 sm:$0xff]   ;;  %v1069_v17 = vld [vmem:[%s1441_s11 + $0x80] ss:$16 sps:$4 sm:$0xff]  }
  0x63   : > { %v1097_v15 = vld [vmem:[%s1434_s12 + $0x4] ss:$16 sps:$4 sm:$0xff]   ;;  %v1100_v16 = vld [vmem:[%s1434_s12 + $0xc] ss:$16 sps:$4 sm:$0xff]   ;;  %v1070_v18 = vld [vmem:[%s1441_s11 + $0x88] ss:$16 sps:$4 sm:$0xff]  }
  0x64   : > { %568 = vmatprep.mubr.bf16.mxu0 %v1097_v15  ;;  %v1071_v19 = vld [vmem:[%s1441_s11 + $0x64] ss:$16 sps:$4 sm:$0xff]   ;;  %v1073_v20 = vld [vmem:[%s1441_s11 + $0x6c] ss:$16 sps:$4 sm:$0xff]   ;;  %609 = vmatprep.mubr.bf16.mxu1 %v1100_v16  ;;  %v1075_v21 = vld [vmem:[%s1441_s11 + $0x60] ss:$16 sps:$4 sm:$0xff]  }
  0x65   : > { %v1076_v22 = vld [vmem:[%s1441_s11 + $0x68] ss:$16 sps:$4 sm:$0xff]   ;;  %v1077_v23 = vld [vmem:[%s1441_s11 + $0x44] ss:$16 sps:$4 sm:$0xff]   ;;  %v1079_v24 = vld [vmem:[%s1441_s11 + $0x4c] ss:$16 sps:$4 sm:$0xff]  }
  0x66   : > { %v1081_v25 = vld [vmem:[%s1441_s11 + $0x40] ss:$16 sps:$4 sm:$0xff]   ;;  %v1082_v26 = vld [vmem:[%s1441_s11 + $0x48] ss:$16 sps:$4 sm:$0xff]   ;;  %v1083_v27 = vld [vmem:[%s1441_s11 + $0x24] ss:$16 sps:$4 sm:$0xff]  }
  0x67   : > { %v1085_v28 = vld [vmem:[%s1441_s11 + $0x2c] ss:$16 sps:$4 sm:$0xff]   ;;  %v1087_v29 = vld [vmem:[%s1441_s11 + $0x20] ss:$16 sps:$4 sm:$0xff]   ;;  %v1088_v30 = vld [vmem:[%s1441_s11 + $0x28] ss:$16 sps:$4 sm:$0xff]  }
  0x68   : > { %539 = vmatpush1.bf16.xpose.msra.mxu0 %v1057_v7  ;;  %580 = vmatpush1.bf16.xpose.msra.mxu1 %v1058_v8  ;;  %v1089_v31 = vld [vmem:[%s1441_s11 + $0x4] ss:$16 sps:$4 sm:$0xff]   ;;  %v1091_v32 = vld [vmem:[%s1441_s11 + $0xc] ss:$16 sps:$4 sm:$0xff]   ;;  %v1093_v33 = vld [vmem:[%s1441_s11] ss:$16 sps:$4 sm:$0xff]  }
  0x69   : > { %540 = vmatprep.subr.bf16.mxu0 %v1059_v9  ;;  %581 = vmatprep.subr.bf16.mxu1 %v1061_v10  ;;  %v1094_v34 = vld [vmem:[%s1441_s11 + $0x8] ss:$16 sps:$4 sm:$0xff]   ;;  %v1095_v35 = vld [vmem:[%s1434_s12] ss:$16 sps:$4 sm:$0xff]   ;;  %p913_p3 = scmp.ne.s32.totalorder %s1269_s21, 3 }
  0x6a   : > { %v1098_v36 = vld [vmem:[%s1434_s12 + $0x8] ss:$16 sps:$4 sm:$0xff]   ;;  %v318_v38 = vld [vmem:[#allocation2] sm:$0xff] }
  0x6b   : > { %v319_v45 = vld [vmem:[#allocation2 + $0x8] sm:$0xff] }
  0x70   : > { %541 = vmatpush1.bf16.xpose.msra.mxu0 %v1063_v11  ;;  %582 = vmatpush1.bf16.xpose.msra.mxu1 %v1064_v12 }
  0x71   : > { %542 = vmatprep.subr.bf16.mxu0 %v1065_v13  ;;  %583 = vmatprep.subr.bf16.mxu1 %v1067_v14 }
  0x78   : > { %543 = vmatpush1.bf16.xpose.msra.mxu0 %v1069_v17  ;;  %584 = vmatpush1.bf16.xpose.msra.mxu1 %v1070_v18 }
  0x79   : > { %544 = vmatprep.subr.bf16.mxu0 %v1071_v19  ;;  %585 = vmatprep.subr.bf16.mxu1 %v1073_v20 }
  0x80   : > { %545 = vmatpush1.bf16.xpose.msra.mxu0 %v1075_v21  ;;  %586 = vmatpush1.bf16.xpose.msra.mxu1 %v1076_v22 }
  0x81   : > { %546 = vmatprep.subr.bf16.mxu0 %v1077_v23  ;;  %587 = vmatprep.subr.bf16.mxu1 %v1079_v24 }
  0x88   : > { %547 = vmatpush1.bf16.xpose.msra.mxu0 %v1081_v25  ;;  %588 = vmatpush1.bf16.xpose.msra.mxu1 %v1082_v26 }
  0x89   : > { %548 = vmatprep.subr.bf16.mxu0 %v1083_v27  ;;  %589 = vmatprep.subr.bf16.mxu1 %v1085_v28 }
  0x90   : > { %549 = vmatpush1.bf16.xpose.msra.mxu0 %v1087_v29  ;;  %590 = vmatpush1.bf16.xpose.msra.mxu1 %v1088_v30 }
  0x91   : > { %550 = vmatprep.subr.bf16.mxu0 %v1089_v31  ;;  %591 = vmatprep.subr.bf16.mxu1 %v1091_v32 }
  0x98   : > { %551 = vmatpush1.bf16.xpose.msra.mxu0 %v1093_v33  ;;  %592 = vmatpush1.bf16.xpose.msra.mxu1 %v1094_v34 }
  0x9f   : > { %569 = vmatmul.mubr.bf16.vlgmr.msra.gmra.mxu0 %v1095_v35  ;;  %610 = vmatmul.mubr.bf16.vlgmr.msra.gmra.mxu1 %v1098_v36 }
 0x15f   : > { %v570_v37 = vpop.f32.mrf.mxu0  ;;  %v611_v39 = vpop.f32.mrf.mxu1 }
 0x160   : > { %v612_v40 = vadd.f32 %v611_v39, %v570_v37 }
 0x161   : > { %v572_v41 = vpop.f32.mrf.mxu0  ;;  %v613_v42 = vpop.f32.mrf.mxu1 }
 0x162   : > { %v618_v43 = vadd.f32 %v612_v40, %v318_v38 }
 0x163   : > { %v573_v44 = vpop.f32.mrf.mxu0  ;;  %v614_v46 = vpop.f32.mrf.mxu1 }
 0x164   : > { %620 = vst [vmem:[#allocation2] sm:$0xff] %v618_v43  ;;  %v615_v47 = vadd.f32 %v614_v46, %v573_v44  ;;  %625 = sbr.rel (%p913_p3) target bundleno = 594 (0x252), region = 60 }
 0x165   : > { %v575_v48 = vpop.f32.mrf.mxu0  ;;  %v616_v49 = vpop.f32.mrf.mxu1 }
 0x166   : > { %v619_v50 = vadd.f32 %v615_v47, %v319_v45 }
 0x168   : > { %621 = vst [vmem:[#allocation2 + $0x8] sm:$0xff] %v619_v50 }
 0x169   : > { %v1101_v51 = vld [vmem:[#allocation8 + $0x38] sm:$0xff]   ;;  %v1288_v52 = vmov 0.0   ;;  %v1102_v53 = vld [vmem:[#allocation8 + $0x30] sm:$0xff]   ;;  %vm1289_vm0 = vmmov 0   ;;  %v1103_v54 = vld [vmem:[#allocation8 + $0x28] sm:$0xff]  }
 0x16a   : > { %939 = vmatprep.subr.bf16.mxu0 %v1288_v52  ;;  %955 = vmatprep.mubr.msk.bf16.mxu0 %vm1289_vm0, %v1288_v52  ;;  %v1104_v55 = vld [vmem:[#allocation8 + $0x20] sm:$0xff]   ;;  %v1105_v56 = vld [vmem:[#allocation8 + $0x18] sm:$0xff]   ;;  %v1106_v57 = vld [vmem:[#allocation8 + $0x10] sm:$0xff]  }
 0x16b   : > { %940 = vmatpush3.bf16.msra.mxu0 %v1101_v51  ;;  %v626_v58 = vld [vmem:[#allocation2] sm:$0xff]  ;;  %v1107_v63 = vld [vmem:[#allocation8 + $0x8] sm:$0xff]   ;;  %v1108_v2 = vld [vmem:[#allocation8] sm:$0xff]  }
 0x16c   : > { %941 = vmatprep.subr.bf16.mxu0 %v1288_v52  ;;  %v914_v60 = vld [vmem:[%s1527_s2] ss:$0 sm:$0xff] }
 0x16d   : > { %v635_v61 = vadd.f32 %v914_v60, %v626_v58  ;;  %v915_v4 = vld [vmem:[%s1529_s4] ss:$0 sm:$0xff] }
 0x16f   : > { %942 = vmatpush3.bf16.msra.mxu0 %v1102_v53  ;;  %v627_v59 = vld [vmem:[#allocation2 + $0x8] sm:$0xff]  ;;  %v637_v0 = vmax.f32 %v635_v61, 0.0 }
 0x170   : > { %943 = vmatprep.subr.bf16.mxu0 %v1288_v52  ;;  %v636_v62 = vadd.f32 %v914_v60, %v627_v59 }
 0x172   : > { %v638_v1 = vmax.f32 %v636_v62, 0.0 }
 0x173   : > { %944 = vmatpush3.bf16.msra.mxu0 %v1103_v54 }
 0x174   : > { %945 = vmatprep.subr.bf16.mxu0 %v1288_v52  ;;  %v639_v3 = vpack.c.bf16 %v638_v1, %v637_v0 }
 0x177   : > { %946 = vmatpush3.bf16.msra.mxu0 %v1104_v55 }
 0x178   : > { %947 = vmatprep.subr.bf16.mxu0 %v1288_v52 }
 0x17b   : > { %948 = vmatpush3.bf16.msra.mxu0 %v1105_v56 }
 0x17c   : > { %949 = vmatprep.subr.bf16.mxu0 %v1288_v52 }
 0x17f   : > { %950 = vmatpush3.bf16.msra.mxu0 %v1106_v57 }
 0x180   : > { %951 = vmatprep.subr.bf16.mxu0 %v1288_v52 }
 0x183   : > { %952 = vmatpush3.bf16.msra.mxu0 %v1107_v63 }
 0x184   : > { %953 = vmatprep.subr.bf16.mxu0 %v1288_v52 }
 0x187   : > { %954 = vmatpush3.bf16.msra.mxu0 %v1108_v2 }
 0x18a   : > { %956 = vmatmul.mubr.bf16.vlgmr.msra.gmra.mxu0 %v639_v3 }
 0x24a   : > { %v745_v5 = vpop.f32.mrf.mxu0 }
 0x24b   : > { %v746_v6 = vadd.f32 %v915_v4, %v745_v5 }
 0x24c   : > { %v957_v7 = vpop.f32.mrf.mxu0 }
 0x24d   : > { %752 = vst [vmem:[#allocation9] sm:$0xff] %v746_v6 }
 0x24e   : > { %v748_v8 = vpop.f32.mrf.mxu0 }
 0x24f   : > { %v749_v9 = vadd.f32 %v915_v4, %v748_v8 }
 0x250   : > { %v958_v10 = vpop.f32.mrf.mxu0 }
 0x251   : > { %753 = vst [vmem:[#allocation9 + $0x8] sm:$0xff] %v749_v9 }
 0x252 PF: > { %p985_p0 = scmp.eq.s32.totalorder %s1352_s24, 3  ;;  %s1290_s17 = smov [#allocation9]  }
 0x253   : > { %s763_s18 = sshll.u32 %s1290_s17, 4  ;;  %s764_s18 = int_to_ptr.vmem [resolvable:$true] %s763_s18 }
 0x254   : > { %s1191_s30 = scalar_lea.vmem %s764_s18, 256  ;;  %p1198_p7 = scmp.lt.s32.totalorder %s764_s18, %s764_s18 }
 0x255   : > { %p1192_p1 = scmp.ne.s32.totalorder %s764_s18, %s1191_s30  ;;  %p1199_p4 = scmp.lt.s32.totalorder %s1191_s30, %s1191_s30 }
 0x257   : > { %p1193_p2 = pnand %p1192_p1, %p985_p0  ;;  %p1200_p6 = por %p1199_p4, %p1198_p7 }
 0x259   : > { %p1194_p5 = pneg %p1193_p2 }
 0x25b   : > { %p1201_p9 = pnand %p1200_p6, %p1194_p5 }
 0x25d   : > { %1204 = shalt.err (!%p1201_p9)
}
 0x25e   : > { %s1291_s9 = smov 128   ;;  %s1292_s10 = smov 8  }
 0x25f   : > { %968 = dma.vmem_to_hbm [thread:$0]  (%p985_p0), %s764_s18, 256, %s1530_s5, [#allocation5], %s1291_s9, %s1291_s9, %s1292_s10  }
 0x260   : > { %1252 = dma.done.wait (%p985_p0), [#allocation5], 256  }
 0x261   : > { %1254 = vsyncadd (%p985_p0), [#allocation5], 4294967040 }
 0x262 PF: > { %s22_s23 = sadd.s32 1, %s1277_s23   ;;  %s1545_s18 = smov %s1261_s19 }
 0x263   : > { %p19_p10 = scmp.ge.s32.totalorder %s22_s23, 6   ;;  %s1546_s19 = smov %s1265_s20 }
 0x264   : > { %s1547_s20 = smov %s1408_s29  ;;  %s1548_s21 = smov %s1273_s22 }
 0x265   : > { %s1549_s22 = smov %s1551_s7  ;;  %21 = sbr.rel (!%p19_p10) target bundleno = 11 (0xb), region = 103 }
 0x26a   :  { %779 = vsyncpa [#allocation4], 1 }
 0x26b   :  { %781 = vsyncpa [#allocation4 + $0x1], 1 }
 0x26c   :  { %782 = vsyncpa [#allocation7], 1 }
 0x26d   :  { %784 = vsyncpa [#allocation7 + $0x1], 1 }
 0x26e   :  { %785 = vsyncpa [#allocation5], 1 }
 0x26f   :  { %787 = vsyncpa [#allocation5 + $0x1], 1 }

</bundles_post_ra>
